<compile_context>
chip_gen: v6e
topology: v6e:2x2x1
jax: 0.10.0
libtpu: 0.0.40
codegen_flags: <defaults>
</compile_context>

<pallas_src>
import functools

import jax
import jax.numpy as jnp
from jax.experimental import pallas as pl
from jax.experimental.pallas import tpu as pltpu


# ----------------------------------------------------------------------------
# Pallas kernel: fused (conv1x1+BN) x2, add, relu, (conv1x1+BN), sigmoid, gate.
# Layout inside the kernel: channels on sublanes, pixels on lanes.
#   g_ref: (F_g, TP)   x_ref: (F_l, TP)
#   wg_ref: (F_int, F_g)  bg_ref: (F_int, 1)   (BN folded)
#   wx_ref: (F_int, F_l)  bx_ref: (F_int, 1)
#   wp_ref: (F_int, 1)    bp_ref: (1, 1)
#   out_ref: (F_l, TP)    psi_ref: (1, TP)
# ----------------------------------------------------------------------------
def _attn_gate_kernel(g_ref, x_ref,
                      wg_ref, bg_ref,
                      wx_ref, bx_ref,
                      wp_ref, bp_ref,
                      out_ref, psi_ref, *, use_mxu):
    g = g_ref[...].astype(jnp.float32)          # (F_g, TP)
    x = x_ref[...].astype(jnp.float32)          # (F_l, TP)
    wg = wg_ref[...].astype(jnp.float32)        # (F_int, F_g)
    wx = wx_ref[...].astype(jnp.float32)        # (F_int, F_l)
    wp = wp_ref[...].astype(jnp.float32)        # (F_int, 1)

    def conv(w, z):
        # (F_out, F_in) @ (F_in, TP) -> (F_out, TP)
        if use_mxu:
            return jnp.dot(w, z, preferred_element_type=jnp.float32)
        # Tiny channel counts: unrolled VPU broadcast-FMAs (MXU would be pure
        # latency at K = a few).
        f_in = w.shape[1]
        acc = w[:, 0:1] * z[0:1, :]
        for ci in range(1, f_in):
            acc = acc + w[:, ci:ci + 1] * z[ci:ci + 1, :]
        return acc

    g1 = conv(wg, g) + bg_ref[...]              # (F_int, TP), bias bcast over lanes
    x1 = conv(wx, x) + bx_ref[...]
    a = jnp.maximum(g1 + x1, 0.0)               # ReLU (VPU)

    # psi projection: single output channel -> VPU multiply + sublane reduce,
    # keeps the MXU out of the N=1 matmul.
    scaled = a * wp                             # (F_int, TP)
    if use_mxu:
        p = jnp.sum(scaled, axis=0, keepdims=True)
    else:
        f_int = scaled.shape[0]
        p = scaled[0:1, :]
        for ci in range(1, f_int):
            p = p + scaled[ci:ci + 1, :]
    p = jax.nn.sigmoid(p + bp_ref[...])         # (1, TP)  (EUP)

    out_ref[...] = (x * p).astype(out_ref.dtype)   # gate bcast over channel sublanes
    psi_ref[...] = p.astype(psi_ref.dtype)         # lane-dense (1, TP) store


def _fold_bn(w, b, gamma, beta, mean, var, eps=1e-5):
    """Fold inference-mode BatchNorm into a 1x1 conv's (w, b).

    w: (C_in, C_out) matmul weight, b: (C_out,) bias.
    y = (z @ w + b - mean) * gamma / sqrt(var + eps) + beta
      =  z @ (w * s) + (b * s + t)   with s = gamma/sqrt(var+eps), t = beta - mean*s
    """
    s = gamma / jnp.sqrt(var + eps)
    t = beta - mean * s
    return w * s[None, :], b * s + t


@functools.partial(jax.jit, static_argnames=("tile_p",))
def attention_block(g, x, params, tile_p=2048):
    """g, x: NCHW arrays with identical N, H, W. Returns (out, psi) in NCHW."""
    N, F_g, H, W = g.shape
    _, F_l, _, _ = x.shape
    HW = H * W

    # NCHW is already contiguous as (N, C, H*W): pure reshape, no transpose.
    g3 = g.reshape(N, F_g, HW)
    x3 = x.reshape(N, F_l, HW)

    # Fold BN into the 1x1 convs (inference-mode running stats).
    wg, bg = _fold_bn(params["wg"], params["bg"], *params["bn_g"])
    wx, bx = _fold_bn(params["wx"], params["bx"], *params["bn_x"])
    wp, bp = _fold_bn(params["wp"], params["bp"], *params["bn_p"])
    F_int = wg.shape[1]

    # Channel-major weight layout for the (C_out, C_in) @ (C_in, pixels) convs.
    wg_t = wg.T                                 # (F_int, F_g)
    wx_t = wx.T                                 # (F_int, F_l)
    wp_c = wp                                   # (F_int, 1)
    bg_c = bg.reshape(F_int, 1)
    bx_c = bx.reshape(F_int, 1)
    bp_c = bp.reshape(1, 1)

    # Lane-dense pixel tile: as large as sensible, clamped to the row length.
    hw_ceil = -(-HW // 128) * 128
    tp = max(128, min(tile_p, hw_ceil))
    tp = (tp // 128) * 128                      # multiple of 128 (lane width)
    if tp >= HW:
        tp = HW                                 # single full-row block (always legal)
    n_pix = -(-HW // tp)
    HW_pad = n_pix * tp
    if HW_pad != HW:                            # pad pixels up to a tile multiple
        pad = HW_pad - HW
        g3 = jnp.pad(g3, ((0, 0), (0, 0), (0, pad)))
        x3 = jnp.pad(x3, ((0, 0), (0, 0), (0, pad)))

    grid = (N, n_pix)
    use_mxu = max(F_g, F_l, F_int) >= 128       # realistic U-Net channel counts

    pix_tile = lambda b, j: (b, 0, j)
    w_full = lambda b, j: (0, 0)

    in_specs = [
        pl.BlockSpec((None, F_g, tp), pix_tile),    # g rows (channels x pixel tile)
        pl.BlockSpec((None, F_l, tp), pix_tile),    # x rows
        pl.BlockSpec((F_int, F_g), w_full),         # Wg (BN-folded), resident
        pl.BlockSpec((F_int, 1), w_full),           # bg
        pl.BlockSpec((F_int, F_l), w_full),         # Wx
        pl.BlockSpec((F_int, 1), w_full),           # bx
        pl.BlockSpec((F_int, 1), w_full),           # Wpsi (as a column)
        pl.BlockSpec((1, 1), w_full),               # bpsi
    ]
    out_specs = [
        pl.BlockSpec((None, F_l, tp), pix_tile),
        pl.BlockSpec((None, 1, tp), pix_tile),      # lane-dense psi slab
    ]
    out_shape = (
        jax.ShapeDtypeStruct((N, F_l, HW_pad), x.dtype),
        jax.ShapeDtypeStruct((N, 1, HW_pad), jnp.float32),
    )

    itemsize = jnp.dtype(x.dtype).itemsize
    cost = pl.CostEstimate(
        flops=int(N * HW * (2 * F_int * (F_g + F_l + 1) + F_l)),
        transcendentals=int(N * HW),
        bytes_accessed=int(N * HW * ((F_g + 2 * F_l) * itemsize + 4)),
    )

    out3, psi3 = pl.pallas_call(
        functools.partial(_attn_gate_kernel, use_mxu=use_mxu),
        out_shape=out_shape,
        grid_spec=pltpu.PrefetchScalarGridSpec(
            num_scalar_prefetch=0,
            grid=grid,
            in_specs=in_specs,
            out_specs=out_specs,
        ),
        compiler_params=pltpu.CompilerParams(
            dimension_semantics=("parallel", "parallel"),
            vmem_limit_bytes=32 * 1024 * 1024,
        ),
        cost_estimate=cost,
    )(g3, x3, wg_t, bg_c, wx_t, bx_c, wp_c, bp_c)

    out = out3[..., :HW].reshape(N, F_l, H, W)
    psi = psi3[..., :HW].reshape(N, 1, H, W)
    return out, psi


# ----------------------------------------------------------------------------
# Pure-JAX reference (mirrors the PyTorch forward in eval mode)
# ----------------------------------------------------------------------------
def reference(g, x, params, eps=1e-5):
    def conv_bn(z2d, w, b, bn):
        gamma, beta, mean, var = bn
        y = z2d @ w + b
        return (y - mean) * gamma / jnp.sqrt(var + eps) + beta

    N, F_g, H, W = g.shape
    F_l = x.shape[1]
    P = N * H * W
    g2d = jnp.transpose(g, (0, 2, 3, 1)).reshape(P, F_g)
    x2d = jnp.transpose(x, (0, 2, 3, 1)).reshape(P, F_l)
    g1 = conv_bn(g2d, params["wg"], params["bg"], params["bn_g"])
    x1 = conv_bn(x2d, params["wx"], params["bx"], params["bn_x"])
    a = jnp.maximum(g1 + x1, 0.0)
    p = jax.nn.sigmoid(conv_bn(a, params["wp"], params["bp"], params["bn_p"]))
    out2d = x2d * p
    out = jnp.transpose(out2d.reshape(N, H, W, F_l), (0, 3, 1, 2))
    psi = jnp.transpose(p.reshape(N, H, W, 1), (0, 3, 1, 2))
    return out, psi


def init_params(key, F_g, F_l, F_int):
    ks = jax.random.split(key, 8)
    params = {
        # conv weights stored as (C_in, C_out) matmul weights for 1x1 convs
        "wg": jax.random.normal(ks[0], (F_g, F_int), jnp.float32) * 0.2,
        "bg": jax.random.normal(ks[1], (F_int,), jnp.float32) * 0.1,
        "wx": jax.random.normal(ks[2], (F_l, F_int), jnp.float32) * 0.2,
        "bx": jax.random.normal(ks[3], (F_int,), jnp.float32) * 0.1,
        "wp": jax.random.normal(ks[4], (F_int, 1), jnp.float32) * 0.2,
        "bp": jax.random.normal(ks[5], (1,), jnp.float32) * 0.1,
        # BatchNorm (gamma, beta, running_mean, running_var) — nontrivial values
        "bn_g": (jnp.linspace(0.9, 1.1, F_int, dtype=jnp.float32),
                 jnp.linspace(-0.1, 0.1, F_int, dtype=jnp.float32),
                 jnp.linspace(-0.05, 0.05, F_int, dtype=jnp.float32),
                 jnp.linspace(0.8, 1.2, F_int, dtype=jnp.float32)),
        "bn_x": (jnp.linspace(1.1, 0.9, F_int, dtype=jnp.float32),
                 jnp.linspace(0.1, -0.1, F_int, dtype=jnp.float32),
                 jnp.linspace(0.05, -0.05, F_int, dtype=jnp.float32),
                 jnp.linspace(1.2, 0.8, F_int, dtype=jnp.float32)),
        "bn_p": (jnp.array([1.05], jnp.float32),
                 jnp.array([0.02], jnp.float32),
                 jnp.array([0.01], jnp.float32),
                 jnp.array([0.95], jnp.float32)),
    }
    return params


if __name__ == "__main__":
    # Small shapes consistent with the module: g, x are NCHW with same spatial dims.
    N, F_g, F_l, F_int, H, W = 2, 4, 4, 8, 16, 16

    key = jax.random.PRNGKey(0)
    kg, kx, kp = jax.random.split(key, 3)
    g = jax.random.normal(kg, (N, F_g, H, W), jnp.float32)
    x = jax.random.normal(kx, (N, F_l, H, W), jnp.float32)
    params = init_params(kp, F_g, F_l, F_int)

    out, psi = attention_block(g, x, params)
    out, psi = jax.block_until_ready(out), jax.block_until_ready(psi)

    out_ref, psi_ref = reference(g, x, params)
    assert out.shape == (N, F_l, H, W) and psi.shape == (N, 1, H, W)
    assert jnp.allclose(out, out_ref, atol=1e-5, rtol=1e-5)
    assert jnp.allclose(psi, psi_ref, atol=1e-5, rtol=1e-5)

    print("KERNEL_OK")
</pallas_src>

<mosaic_0001>
module attributes {stable_mosaic.version = 11 : i64} {
  func.func @_attn_gate_kernel(%arg0: i32, %arg1: i32, %arg2: memref<1x4x256xf32, #tpu.memory_space<vmem>>, %arg3: memref<1x4x256xf32, #tpu.memory_space<vmem>>, %arg4: memref<8x4xf32, #tpu.memory_space<vmem>>, %arg5: memref<8x1xf32, #tpu.memory_space<vmem>>, %arg6: memref<8x4xf32, #tpu.memory_space<vmem>>, %arg7: memref<8x1xf32, #tpu.memory_space<vmem>>, %arg8: memref<8x1xf32, #tpu.memory_space<vmem>>, %arg9: memref<1x1xf32, #tpu.memory_space<vmem>>, %arg10: memref<1x4x256xf32, #tpu.memory_space<vmem>>, %arg11: memref<1x1x256xf32, #tpu.memory_space<vmem>>) attributes {dimension_semantics = [#tpu.dimension_semantics<parallel>, #tpu.dimension_semantics<parallel>], iteration_bounds = array<i64: 2, 1>, scalar_prefetch = 0 : i64, scratch_operands = 0 : i64, tpu.core_type = #tpu.core_type<tc>, window_params = [{transform_indices = @transform_0, window_bounds = array<i64: 1, 4, 256>}, {transform_indices = @transform_1, window_bounds = array<i64: 1, 4, 256>}, {pipeline_mode = #tpu.pipeline_mode<synchronous>, transform_indices = @transform_2, window_bounds = array<i64: 8, 4>}, {pipeline_mode = #tpu.pipeline_mode<synchronous>, transform_indices = @transform_3, window_bounds = array<i64: 8, 1>}, {pipeline_mode = #tpu.pipeline_mode<synchronous>, transform_indices = @transform_4, window_bounds = array<i64: 8, 4>}, {pipeline_mode = #tpu.pipeline_mode<synchronous>, transform_indices = @transform_5, window_bounds = array<i64: 8, 1>}, {pipeline_mode = #tpu.pipeline_mode<synchronous>, transform_indices = @transform_6, window_bounds = array<i64: 8, 1>}, {pipeline_mode = #tpu.pipeline_mode<synchronous>, transform_indices = @transform_7, window_bounds = array<i64: 1, 1>}, {transform_indices = @transform_8, window_bounds = array<i64: 1, 4, 256>}, {transform_indices = @transform_9, window_bounds = array<i64: 1, 1, 256>}]} {
    %c0 = arith.constant 0 : index
    %c0_0 = arith.constant 0 : index
    %c0_1 = arith.constant 0 : index
    %0 = vector.load %arg2[%c0, %c0_0, %c0_1] : memref<1x4x256xf32, #tpu.memory_space<vmem>>, vector<1x4x256xf32>
    %1 = vector.shape_cast %0 : vector<1x4x256xf32> to vector<4x256xf32>
    %c0_2 = arith.constant 0 : index
    %c0_3 = arith.constant 0 : index
    %c0_4 = arith.constant 0 : index
    %2 = vector.load %arg3[%c0_2, %c0_3, %c0_4] : memref<1x4x256xf32, #tpu.memory_space<vmem>>, vector<1x4x256xf32>
    %3 = vector.shape_cast %2 : vector<1x4x256xf32> to vector<4x256xf32>
    %c0_5 = arith.constant 0 : index
    %c0_6 = arith.constant 0 : index
    %4 = vector.load %arg4[%c0_5, %c0_6] : memref<8x4xf32, #tpu.memory_space<vmem>>, vector<8x4xf32>
    %c0_7 = arith.constant 0 : index
    %c0_8 = arith.constant 0 : index
    %5 = vector.load %arg6[%c0_7, %c0_8] : memref<8x4xf32, #tpu.memory_space<vmem>>, vector<8x4xf32>
    %c0_9 = arith.constant 0 : index
    %c0_10 = arith.constant 0 : index
    %6 = vector.load %arg8[%c0_9, %c0_10] : memref<8x1xf32, #tpu.memory_space<vmem>>, vector<8x1xf32>
    %7 = vector.extract_strided_slice %4 {offsets = [0, 0], sizes = [8, 1], strides = [1, 1]} : vector<8x4xf32> to vector<8x1xf32>
    %8 = vector.extract_strided_slice %1 {offsets = [0, 0], sizes = [1, 256], strides = [1, 1]} : vector<4x256xf32> to vector<1x256xf32>
    %9 = vector.broadcast %7 : vector<8x1xf32> to vector<8x256xf32>
    %10 = vector.broadcast %8 : vector<1x256xf32> to vector<8x256xf32>
    %11 = arith.mulf %9, %10 : vector<8x256xf32>
    %12 = vector.extract_strided_slice %4 {offsets = [0, 1], sizes = [8, 1], strides = [1, 1]} : vector<8x4xf32> to vector<8x1xf32>
    %13 = vector.extract_strided_slice %1 {offsets = [1, 0], sizes = [1, 256], strides = [1, 1]} : vector<4x256xf32> to vector<1x256xf32>
    %14 = vector.broadcast %12 : vector<8x1xf32> to vector<8x256xf32>
    %15 = vector.broadcast %13 : vector<1x256xf32> to vector<8x256xf32>
    %16 = arith.mulf %14, %15 : vector<8x256xf32>
    %17 = arith.addf %11, %16 : vector<8x256xf32>
    %18 = vector.extract_strided_slice %4 {offsets = [0, 2], sizes = [8, 1], strides = [1, 1]} : vector<8x4xf32> to vector<8x1xf32>
    %19 = vector.extract_strided_slice %1 {offsets = [2, 0], sizes = [1, 256], strides = [1, 1]} : vector<4x256xf32> to vector<1x256xf32>
    %20 = vector.broadcast %18 : vector<8x1xf32> to vector<8x256xf32>
    %21 = vector.broadcast %19 : vector<1x256xf32> to vector<8x256xf32>
    %22 = arith.mulf %20, %21 : vector<8x256xf32>
    %23 = arith.addf %17, %22 : vector<8x256xf32>
    %24 = vector.extract_strided_slice %4 {offsets = [0, 3], sizes = [8, 1], strides = [1, 1]} : vector<8x4xf32> to vector<8x1xf32>
    %25 = vector.extract_strided_slice %1 {offsets = [3, 0], sizes = [1, 256], strides = [1, 1]} : vector<4x256xf32> to vector<1x256xf32>
    %26 = vector.broadcast %24 : vector<8x1xf32> to vector<8x256xf32>
    %27 = vector.broadcast %25 : vector<1x256xf32> to vector<8x256xf32>
    %28 = arith.mulf %26, %27 : vector<8x256xf32>
    %29 = arith.addf %23, %28 : vector<8x256xf32>
    %c0_11 = arith.constant 0 : index
    %c0_12 = arith.constant 0 : index
    %30 = vector.load %arg5[%c0_11, %c0_12] : memref<8x1xf32, #tpu.memory_space<vmem>>, vector<8x1xf32>
    %31 = vector.broadcast %30 : vector<8x1xf32> to vector<8x256xf32>
    %32 = arith.addf %29, %31 : vector<8x256xf32>
    %33 = vector.extract_strided_slice %5 {offsets = [0, 0], sizes = [8, 1], strides = [1, 1]} : vector<8x4xf32> to vector<8x1xf32>
    %34 = vector.extract_strided_slice %3 {offsets = [0, 0], sizes = [1, 256], strides = [1, 1]} : vector<4x256xf32> to vector<1x256xf32>
    %35 = vector.broadcast %33 : vector<8x1xf32> to vector<8x256xf32>
    %36 = vector.broadcast %34 : vector<1x256xf32> to vector<8x256xf32>
    %37 = arith.mulf %35, %36 : vector<8x256xf32>
    %38 = vector.extract_strided_slice %5 {offsets = [0, 1], sizes = [8, 1], strides = [1, 1]} : vector<8x4xf32> to vector<8x1xf32>
    %39 = vector.extract_strided_slice %3 {offsets = [1, 0], sizes = [1, 256], strides = [1, 1]} : vector<4x256xf32> to vector<1x256xf32>
    %40 = vector.broadcast %38 : vector<8x1xf32> to vector<8x256xf32>
    %41 = vector.broadcast %39 : vector<1x256xf32> to vector<8x256xf32>
    %42 = arith.mulf %40, %41 : vector<8x256xf32>
    %43 = arith.addf %37, %42 : vector<8x256xf32>
    %44 = vector.extract_strided_slice %5 {offsets = [0, 2], sizes = [8, 1], strides = [1, 1]} : vector<8x4xf32> to vector<8x1xf32>
    %45 = vector.extract_strided_slice %3 {offsets = [2, 0], sizes = [1, 256], strides = [1, 1]} : vector<4x256xf32> to vector<1x256xf32>
    %46 = vector.broadcast %44 : vector<8x1xf32> to vector<8x256xf32>
    %47 = vector.broadcast %45 : vector<1x256xf32> to vector<8x256xf32>
    %48 = arith.mulf %46, %47 : vector<8x256xf32>
    %49 = arith.addf %43, %48 : vector<8x256xf32>
    %50 = vector.extract_strided_slice %5 {offsets = [0, 3], sizes = [8, 1], strides = [1, 1]} : vector<8x4xf32> to vector<8x1xf32>
    %51 = vector.extract_strided_slice %3 {offsets = [3, 0], sizes = [1, 256], strides = [1, 1]} : vector<4x256xf32> to vector<1x256xf32>
    %52 = vector.broadcast %50 : vector<8x1xf32> to vector<8x256xf32>
    %53 = vector.broadcast %51 : vector<1x256xf32> to vector<8x256xf32>
    %54 = arith.mulf %52, %53 : vector<8x256xf32>
    %55 = arith.addf %49, %54 : vector<8x256xf32>
    %c0_13 = arith.constant 0 : index
    %c0_14 = arith.constant 0 : index
    %56 = vector.load %arg7[%c0_13, %c0_14] : memref<8x1xf32, #tpu.memory_space<vmem>>, vector<8x1xf32>
    %57 = vector.broadcast %56 : vector<8x1xf32> to vector<8x256xf32>
    %58 = arith.addf %55, %57 : vector<8x256xf32>
    %59 = arith.addf %32, %58 : vector<8x256xf32>
    %cst = arith.constant 0.000000e+00 : f32
    %60 = vector.broadcast %cst : f32 to vector<8x256xf32>
    %61 = arith.maximumf %59, %60 : vector<8x256xf32>
    %62 = vector.broadcast %6 : vector<8x1xf32> to vector<8x256xf32>
    %63 = arith.mulf %61, %62 : vector<8x256xf32>
    %64 = vector.extract_strided_slice %63 {offsets = [0, 0], sizes = [1, 256], strides = [1, 1]} : vector<8x256xf32> to vector<1x256xf32>
    %65 = vector.extract_strided_slice %63 {offsets = [1, 0], sizes = [1, 256], strides = [1, 1]} : vector<8x256xf32> to vector<1x256xf32>
    %66 = arith.addf %64, %65 : vector<1x256xf32>
    %67 = vector.extract_strided_slice %63 {offsets = [2, 0], sizes = [1, 256], strides = [1, 1]} : vector<8x256xf32> to vector<1x256xf32>
    %68 = arith.addf %66, %67 : vector<1x256xf32>
    %69 = vector.extract_strided_slice %63 {offsets = [3, 0], sizes = [1, 256], strides = [1, 1]} : vector<8x256xf32> to vector<1x256xf32>
    %70 = arith.addf %68, %69 : vector<1x256xf32>
    %71 = vector.extract_strided_slice %63 {offsets = [4, 0], sizes = [1, 256], strides = [1, 1]} : vector<8x256xf32> to vector<1x256xf32>
    %72 = arith.addf %70, %71 : vector<1x256xf32>
    %73 = vector.extract_strided_slice %63 {offsets = [5, 0], sizes = [1, 256], strides = [1, 1]} : vector<8x256xf32> to vector<1x256xf32>
    %74 = arith.addf %72, %73 : vector<1x256xf32>
    %75 = vector.extract_strided_slice %63 {offsets = [6, 0], sizes = [1, 256], strides = [1, 1]} : vector<8x256xf32> to vector<1x256xf32>
    %76 = arith.addf %74, %75 : vector<1x256xf32>
    %77 = vector.extract_strided_slice %63 {offsets = [7, 0], sizes = [1, 256], strides = [1, 1]} : vector<8x256xf32> to vector<1x256xf32>
    %78 = arith.addf %76, %77 : vector<1x256xf32>
    %c0_15 = arith.constant 0 : index
    %c0_16 = arith.constant 0 : index
    %79 = vector.load %arg9[%c0_15, %c0_16] : memref<1x1xf32, #tpu.memory_space<vmem>>, vector<1x1xf32>
    %80 = vector.broadcast %79 : vector<1x1xf32> to vector<1x256xf32>
    %81 = arith.addf %78, %80 : vector<1x256xf32>
    %82 = arith.negf %81 : vector<1x256xf32>
    %83 = math.exp %82 : vector<1x256xf32>
    %cst_17 = arith.constant 1.000000e+00 : f32
    %84 = vector.broadcast %cst_17 : f32 to vector<1x256xf32>
    %85 = arith.addf %84, %83 : vector<1x256xf32>
    %86 = arith.divf %84, %85 : vector<1x256xf32>
    %87 = vector.broadcast %86 : vector<1x256xf32> to vector<4x256xf32>
    %88 = arith.mulf %3, %87 : vector<4x256xf32>
    %c0_18 = arith.constant 0 : index
    %c0_19 = arith.constant 0 : index
    %c0_20 = arith.constant 0 : index
    %89 = vector.load %arg10[%c0_18, %c0_19, %c0_20] : memref<1x4x256xf32, #tpu.memory_space<vmem>>, vector<1x4x256xf32>
    %90 = vector.shape_cast %89 : vector<1x4x256xf32> to vector<4x256xf32>
    %91 = vector.shape_cast %88 : vector<4x256xf32> to vector<1x4x256xf32>
    tpu.vector_store %arg10[%c0_18, %c0_19, %c0_20], %91 {strides = array<i32>} : memref<1x4x256xf32, #tpu.memory_space<vmem>>, vector<1x4x256xf32>,
    %c0_21 = arith.constant 0 : index
    %c0_22 = arith.constant 0 : index
    %c0_23 = arith.constant 0 : index
    %92 = vector.load %arg11[%c0_21, %c0_22, %c0_23] : memref<1x1x256xf32, #tpu.memory_space<vmem>>, vector<1x1x256xf32>
    %93 = vector.shape_cast %92 : vector<1x1x256xf32> to vector<1x256xf32>
    %94 = vector.shape_cast %86 : vector<1x256xf32> to vector<1x1x256xf32>
    tpu.vector_store %arg11[%c0_21, %c0_22, %c0_23], %94 {strides = array<i32>} : memref<1x1x256xf32, #tpu.memory_space<vmem>>, vector<1x1x256xf32>,
    return
  }
  func.func @transform_0(%arg0: i32, %arg1: i32) -> (i32, i32, i32) {
    %c0_i32 = arith.constant 0 : i32
    %c0_i32_0 = arith.constant 0 : i32
    return %arg0, %c0_i32, %arg1 : i32, i32, i32
  }
  func.func @transform_1(%arg0: i32, %arg1: i32) -> (i32, i32, i32) {
    %c0_i32 = arith.constant 0 : i32
    %c0_i32_0 = arith.constant 0 : i32
    return %arg0, %c0_i32, %arg1 : i32, i32, i32
  }
  func.func @transform_2(%arg0: i32, %arg1: i32) -> (i32, i32) {
    %c0_i32 = arith.constant 0 : i32
    %c0_i32_0 = arith.constant 0 : i32
    %c0_i32_1 = arith.constant 0 : i32
    return %c0_i32, %c0_i32_0 : i32, i32
  }
  func.func @transform_3(%arg0: i32, %arg1: i32) -> (i32, i32) {
    %c0_i32 = arith.constant 0 : i32
    %c0_i32_0 = arith.constant 0 : i32
    %c0_i32_1 = arith.constant 0 : i32
    return %c0_i32, %c0_i32_0 : i32, i32
  }
  func.func @transform_4(%arg0: i32, %arg1: i32) -> (i32, i32) {
    %c0_i32 = arith.constant 0 : i32
    %c0_i32_0 = arith.constant 0 : i32
    %c0_i32_1 = arith.constant 0 : i32
    return %c0_i32, %c0_i32_0 : i32, i32
  }
  func.func @transform_5(%arg0: i32, %arg1: i32) -> (i32, i32) {
    %c0_i32 = arith.constant 0 : i32
    %c0_i32_0 = arith.constant 0 : i32
    %c0_i32_1 = arith.constant 0 : i32
    return %c0_i32, %c0_i32_0 : i32, i32
  }
  func.func @transform_6(%arg0: i32, %arg1: i32) -> (i32, i32) {
    %c0_i32 = arith.constant 0 : i32
    %c0_i32_0 = arith.constant 0 : i32
    %c0_i32_1 = arith.constant 0 : i32
    return %c0_i32, %c0_i32_0 : i32, i32
  }
  func.func @transform_7(%arg0: i32, %arg1: i32) -> (i32, i32) {
    %c0_i32 = arith.constant 0 : i32
    %c0_i32_0 = arith.constant 0 : i32
    %c0_i32_1 = arith.constant 0 : i32
    return %c0_i32, %c0_i32_0 : i32, i32
  }
  func.func @transform_8(%arg0: i32, %arg1: i32) -> (i32, i32, i32) {
    %c0_i32 = arith.constant 0 : i32
    %c0_i32_0 = arith.constant 0 : i32
    return %arg0, %c0_i32, %arg1 : i32, i32, i32
  }
  func.func @transform_9(%arg0: i32, %arg1: i32) -> (i32, i32, i32) {
    %c0_i32 = arith.constant 0 : i32
    %c0_i32_0 = arith.constant 0 : i32
    return %arg0, %c0_i32, %arg1 : i32, i32, i32
  }
}

</mosaic_0001>

<bundles_post_ra>
// kernel: attention_block.1
= control target key start
LH: loop header
LB: loop body
LE: loop exit
PB: predicated region body
PF: predicated region fallthrough
CT: control target
= control target key end

     0   :  { %s1073_s11 = smov 0   ;;  %s1075_s12 = smov 0   ;;  %s1175_s0 = inlined_call_operand.vmem [shape: f32[2,4,256], index: 0, kind: input, shape index: {}]   ;;  %s1176_s1 = inlined_call_operand.vmem [shape: f32[2,4,256], index: 1, kind: input, shape index: {}]   ;;  %s1177_s2 = inlined_call_operand.vmem [shape: f32[8,4], index: 2, kind: input, shape index: {}]   ;;  %s1178_s3 = inlined_call_operand.vmem [shape: f32[8,1], index: 3, kind: input, shape index: {}]   ;;  %s1179_s4 = inlined_call_operand.vmem [shape: f32[8,4], index: 4, kind: input, shape index: {}]   ;;  %s1180_s5 = inlined_call_operand.vmem [shape: f32[8,1], index: 5, kind: input, shape index: {}]   ;;  %s1181_s6 = inlined_call_operand.vmem [shape: f32[8,1], index: 6, kind: input, shape index: {}]   ;;  %s1182_s7 = inlined_call_operand.<no memory space> [shape: f32[1,1], index: 7, kind: input, shape index: {}]   ;;  %s1183_s8 = inlined_call_operand.vmem [shape: f32[2,4,256], index: 8, kind: output, shape index: {0}]   ;;  %s1184_s9 = inlined_call_operand.vmem [shape: f32[2,1,256], index: 9, kind: output, shape index: {1}]  }
   0x1   :  { %v15_v0 = vstv %s1182_s7  ;;  %s1077_s13 = smov 0  }
   0x2   :  { %16 = vst [vmem:[#allocation2] sm:$0x1] %v15_v0 }
   0x3 LB: > { %s34_s7 = sadd.s32 1, %s1009_s12  ;;  %p930_p0 = scmp.ge.s32.totalorder %s1013_s13, 1  ;;  %s1013_s13 = sphi %s1077_s13, %s22_s13   ;;  %s1009_s12 = sphi %s1075_s12, %s1186_s12   ;;  %s1005_s11 = sphi %s1073_s11, %s1185_s11  }
   0x4   : > { %p36_p1 = scmp.ge.s32.totalorder %s34_s7, 2  ;;  %p332_p2 = scmp.lt.s32.totalorder %s1013_s13, 3 }
   0x6   : > { %s1188_s7 = smov (%p36_p1, %s34_s7), 0  ;;  %p333_p3 = pnand %p930_p0, %p332_p2 }
   0x7   : > { %p394_p4 = scmp.lt.s32.totalorder (!%p333_p3), %s1005_s11, 1 }
   0x8   : > { %336 = sbr.rel (%p333_p3) target bundleno = 229 (0xe5), region = 52 }
   0xd   : > { %v435_v1 = vld [vmem:[%s1179_s4] sm:$0xff]  ;;  %v1015_v3 = vmov 0   ;;  %v1016_v4 = vmov 1   ;;  %v1017_v5 = vmov 2   ;;  %v1018_v7 = vmov 3   ;;  %s1190_s11 = smov (!%p394_p4, %s1005_s11), 1 }
   0xe   : > { %v434_v2 = vld [vmem:[%s1177_s2] sm:$0xff]  ;;  %976 = vset.pattern.permute.xlu1 %v1015_v3  ;;  %974 = vset.pattern.permute.xlu0 %v1015_v3  ;;  %v443_v11 = vlaneseq  ;;  %s1113_s24 = sshll.u32 %s1190_s11, 3  ;;  %s937_s10 = sshll.u32 %s1190_s11, 1 }
   0xf   : > { %551 = vperm.xlu1 %976, %v435_v1   ;;  %439 = vperm.xlu0 %974, %v434_v2   ;;  %v541_v6 = vld [vmem:[%s1178_s3] sm:$0xff]  ;;  %s401_s27 = scalar_lea.vmem %s1175_s0, %s1113_s24  ;;  %s411_s30 = scalar_lea.vmem %s1176_s1, %s1113_s24 }
  0x10   : > { %v716_v8 = vld [vmem:[#allocation2] sm:$0x1]  ;;  %v1116_v12 = vshrl.u32 %v443_v11, 7  ;;  %vm774_vm0 = vcmp.lt.s32.totalorder %v443_v11, 256  ;;  %s421_s16 = scalar_lea.vmem %s1183_s8, %s1113_s24  ;;  %s430_s19 = scalar_lea.vmem %s1184_s9, %s937_s10 }
  0x11   : > { %v653_v9 = vld [vmem:[%s1180_s5] sm:$0xff] }
  0x12   : > { %v436_v10 = vld [vmem:[%s1181_s6] sm:$0xff]  ;;  %v1123_v15 = vsub.s32 0, %v1116_v12  ;;  %v449_v16 = vsub.s32 4, %v1116_v12  ;;  %v469_v18 = vsub.s32 1, %v1116_v12  ;;  %v473_v19 = vsub.s32 5, %v1116_v12 }
  0x13   : > { %977 = vset.pattern.permute.xlu1 %v1016_v4  ;;  %975 = vset.pattern.permute.xlu0 %v1016_v4  ;;  %v432_v14 = vld [vmem:[%s401_s27] sm:$0xff]  ;;  %v495_v20 = vsub.s32 2, %v1116_v12  ;;  %v499_v21 = vsub.s32 6, %v1116_v12  ;;  %v521_v30 = vsub.s32 3, %v1116_v12  ;;  %v525_v31 = vsub.s32 7, %v1116_v12 }
  0x14   : > { %576 = vperm.xlu1 %977, %v435_v1   ;;  %464 = vperm.xlu0 %975, %v434_v2   ;;  %v446_v22 = vrot.slane %v432_v14, %v1123_v15  ;;  %v450_v23 = vrot.slane %v432_v14, %v449_v16  ;;  %v470_v24 = vrot.slane %v432_v14, %v469_v18  ;;  %v1135_v26 = vld [vmem:[%s411_s30] sm:$0xff] }
  0x15   : > { %v474_v25 = vrot.slane %v432_v14, %v473_v19  ;;  %v582_v28 = vrot.slane %v1135_v26, %v469_v18  ;;  %v586_v29 = vrot.slane %v1135_v26, %v473_v19  ;;  %v496_v32 = vrot.slane %v432_v14, %v495_v20 }
  0x16   : > { %v500_v33 = vrot.slane %v432_v14, %v499_v21  ;;  %v456_v34 = vrot.slane %v446_v22, %v1123_v15  ;;  %v460_v35 = vrot.slane %v450_v23, %v1123_v15  ;;  %v480_v37 = vrot.slane %v470_v24, %v469_v18 }
  0x17   : > { %v484_v38 = vrot.slane %v474_v25, %v469_v18  ;;  %v558_v39 = vrot.slane %v1135_v26, %v1123_v15  ;;  %v562_v40 = vrot.slane %v1135_v26, %v449_v16  ;;  %v608_v41 = vrot.slane %v1135_v26, %v495_v20 }
  0x18   : > { %978 = vset.pattern.permute.xlu1 %v1017_v5  ;;  %979 = vset.pattern.permute.xlu0 %v1017_v5  ;;  %v612_v42 = vrot.slane %v1135_v26, %v499_v21  ;;  %v592_v43 = vrot.slane %v582_v28, %v469_v18  ;;  %v596_v44 = vrot.slane %v586_v29, %v469_v18 }
  0x19   : > { %490 = vperm.xlu1 %978, %v434_v2   ;;  %602 = vperm.xlu0 %979, %v435_v1   ;;  %v522_v45 = vrot.slane %v432_v14, %v521_v30  ;;  %v526_v46 = vrot.slane %v432_v14, %v525_v31  ;;  %v506_v48 = vrot.slane %v496_v32, %v495_v20 }
  0x1a   : > { %v510_v49 = vrot.slane %v500_v33, %v495_v20  ;;  %v634_v50 = vrot.slane %v1135_v26, %v521_v30  ;;  %v638_v51 = vrot.slane %v1135_v26, %v525_v31  ;;  %v568_v56 = vrot.slane %v558_v39, %v1123_v15 }
  0x1b   : > { %v572_v57 = vrot.slane %v562_v40, %v1123_v15  ;;  %v618_v58 = vrot.slane %v608_v41, %v495_v20  ;;  %v622_v59 = vrot.slane %v612_v42, %v495_v20  ;;  %v532_v61 = vrot.slane %v522_v45, %v521_v30 }
  0x1c   : > { %v536_v62 = vrot.slane %v526_v46, %v521_v30 }
  0x1d   : > { %980 = vset.pattern.permute.xlu1 %v1018_v7  ;;  %981 = vset.pattern.permute.xlu0 %v1015_v3 }
  0x1e   : > { %516 = vperm.xlu1 %980, %v434_v2   ;;  %544 = vperm.xlu0 %981, %v541_v6   ;;  %v648_v2 = vrot.slane %v638_v51, %v521_v30 }
  0x22   : > { %628 = vperm.xlu1 %980, %v435_v1   ;;  %719 = vperm.xlu0 %981, %v716_v8   ;;  %v644_v1 = vrot.slane %v634_v50, %v521_v30 }
  0x26   : > { %982 = vset.pattern.permute.xlu1 %v1015_v3 }
  0x27   : > { %656 = vperm.xlu1 %982, %v653_v9  }
  0x2b   : > { %667 = vperm.xlu1 %982, %v436_v10  }
  0x8a   : > { %v552_v13 = vpop.permute.xlu1 %551  ;;  %v440_v17 = vpop.permute.xlu0 %439 }
  0x8b   : > { %v461_v52 = vmul.f32 %v456_v34, %v440_v17  ;;  %v462_v53 = vmul.f32 %v460_v35, %v440_v17  ;;  %v573_v8 = vmul.f32 %v568_v56, %v552_v13  ;;  %v574_v9 = vmul.f32 %v572_v57, %v552_v13 }
  0x8f   : > { %v577_v27 = vpop.permute.xlu1 %576  ;;  %v465_v36 = vpop.permute.xlu0 %464 }
  0x90   : > { %v485_v54 = vmul.f32 %v480_v37, %v465_v36  ;;  %v486_v55 = vmul.f32 %v484_v38, %v465_v36  ;;  %v597_v63 = vmul.f32 %v592_v43, %v577_v27  ;;  %v598_v0 = vmul.f32 %v596_v44, %v577_v27 }
  0x92   : > { %v487_v3 = vadd.f32 %v485_v54, %v461_v52  ;;  %v488_v4 = vadd.f32 %v486_v55, %v462_v53  ;;  %v599_v18 = vadd.f32 %v597_v63, %v573_v8  ;;  %v600_v19 = vadd.f32 %v598_v0, %v574_v9 }
  0x94   : > { %v491_v47 = vpop.permute.xlu1 %490  ;;  %v603_v60 = vpop.permute.xlu0 %602 }
  0x95   : > { %v511_v5 = vmul.f32 %v506_v48, %v491_v47  ;;  %v512_v6 = vmul.f32 %v510_v49, %v491_v47  ;;  %v623_v10 = vmul.f32 %v618_v58, %v603_v60  ;;  %v624_v14 = vmul.f32 %v622_v59, %v603_v60 }
  0x97   : > { %v513_v20 = vadd.f32 %v511_v5, %v487_v3  ;;  %v514_v21 = vadd.f32 %v512_v6, %v488_v4  ;;  %v625_v23 = vadd.f32 %v623_v10, %v599_v18  ;;  %v626_v24 = vadd.f32 %v624_v14, %v600_v19 }
  0x99   : > { %v517_v7 = vpop.permute.xlu1 %516  ;;  %v545_v30 = vpop.permute.xlu0 %544 }
  0x9a   : > { %v537_v16 = vmul.f32 %v532_v61, %v517_v7  ;;  %v538_v17 = vmul.f32 %v536_v62, %v517_v7 }
  0x9c   : > { %v539_v28 = vadd.f32 %v537_v16, %v513_v20  ;;  %v540_v29 = vadd.f32 %v538_v17, %v514_v21 }
  0x9d   : > { %v629_v22 = vpop.permute.xlu1 %628 }
  0x9e   : > { %v649_v25 = vmul.f32 %v644_v1, %v629_v22  ;;  %v650_v27 = vmul.f32 %v648_v2, %v629_v22  ;;  %v547_v13 = vadd.f32 %v545_v30, %v539_v28  ;;  %v548_v34 = vadd.f32 %v545_v30, %v540_v29  ;;  %v720_v2 = vpop.permute.xlu0 %719 }
  0x9f   : > { %v725_v7 = vrot.slane %v720_v2, %v1123_v15  ;;  %v1019_v22 = vmov 1966171168  }
  0xa0   : > { %v651_v31 = vadd.f32 %v649_v25, %v625_v23  ;;  %v652_v32 = vadd.f32 %v650_v27, %v626_v24  ;;  %v758_v23 = vunpack.c.l.s4 %v1019_v22 }
  0xa2   : > { %v657_v33 = vpop.permute.xlu1 %656  ;;  %v759_v24 = vunpack.c.0.s8 %v758_v23 }
  0xa3   : > { %v659_v35 = vadd.f32 %v657_v33, %v651_v31  ;;  %v660_v36 = vadd.f32 %v657_v33, %v652_v32 }
  0xa4   : > { %v762_v27 = vsub.s32 %v759_v24, %v1116_v12 }
  0xa5   : > { %v661_v37 = vadd.f32 %v659_v35, %v547_v13  ;;  %v662_v38 = vadd.f32 %v660_v36, %v548_v34 }
  0xa6   : > { %v668_v41 = vpop.permute.xlu1 %667 }
  0xa7   : > { %v663_v39 = vmax.f32 %v661_v37, 0.0  ;;  %v664_v40 = vmax.f32 %v662_v38, 0.0 }
  0xa9   : > { %v670_v42 = vmul.f32 %v668_v41, %v663_v39  ;;  %v671_v43 = vmul.f32 %v668_v41, %v664_v40 }
  0xab   : > { %v674_v44 = vrot.slane %v670_v42, 1  ;;  %v675_v45 = vrot.slane %v671_v43, 1  ;;  %v680_v48 = vrot.slane %v670_v42, 2  ;;  %v681_v49 = vrot.slane %v671_v43, 2 }
  0xac   : > { %v686_v52 = vrot.slane %v670_v42, 3  ;;  %v687_v53 = vrot.slane %v671_v43, 3  ;;  %v692_v56 = vrot.slane %v670_v42, 4  ;;  %v693_v57 = vrot.slane %v671_v43, 4 }
  0xad   : > { %v678_v46 = vadd.f32 %v674_v44, %v670_v42  ;;  %v679_v47 = vadd.f32 %v675_v45, %v671_v43  ;;  %v698_v60 = vrot.slane %v670_v42, 5  ;;  %v699_v61 = vrot.slane %v671_v43, 5 }
  0xae   : > { %v704_v0 = vrot.slane %v670_v42, 6  ;;  %v705_v1 = vrot.slane %v671_v43, 6  ;;  %v710_v5 = vrot.slane %v670_v42, 7  ;;  %v711_v6 = vrot.slane %v671_v43, 7 }
  0xaf   : > { %v684_v50 = vadd.f32 %v680_v48, %v678_v46  ;;  %v685_v51 = vadd.f32 %v681_v49, %v679_v47 }
  0xb1   : > { %v690_v54 = vadd.f32 %v686_v52, %v684_v50  ;;  %v691_v55 = vadd.f32 %v687_v53, %v685_v51 }
  0xb3   : > { %v696_v58 = vadd.f32 %v692_v56, %v690_v54  ;;  %v697_v59 = vadd.f32 %v693_v57, %v691_v55 }
  0xb5   : > { %v702_v62 = vadd.f32 %v698_v60, %v696_v58  ;;  %v703_v63 = vadd.f32 %v699_v61, %v697_v59 }
  0xb7   : > { %v708_v3 = vadd.f32 %v704_v0, %v702_v62  ;;  %v709_v4 = vadd.f32 %v705_v1, %v703_v63 }
  0xb9   : > { %v714_v8 = vadd.f32 %v710_v5, %v708_v3  ;;  %v715_v9 = vadd.f32 %v711_v6, %v709_v4 }
  0xbb   : > { %v726_v10 = vadd.f32 %v725_v7, %v714_v8  ;;  %v727_v14 = vadd.f32 %v725_v7, %v715_v9 }
  0xbd   : > { %v938_v16 = vmul.f32 -1.442695, %v726_v10  ;;  %v939_v17 = vmul.f32 -1.442695, %v727_v14 }
  0xbf   : > { %983 = vpow2.f32 %v938_v16 }
  0xc0   : > { %985 = vpow2.f32 %v939_v17 }
  0xcc   : > { %v984_v18 = vpop.eup %983 }
  0xcd   : > { %v986_v19 = vpop.eup %985  ;;  %v734_v20 = vadd.f32 1.0, %v984_v18 }
  0xce   : > { %v735_v21 = vadd.f32 1.0, %v986_v19 }
  0xcf   : > { %987 = vrcp.f32 %v734_v20 }
  0xd0   : > { %989 = vrcp.f32 %v735_v21 }
  0xdc   : > { %v988_v25 = vpop.eup %987 }
  0xdd   : > { %v990_v28 = vpop.eup %989  ;;  %v743_v29 = vrot.slane %v988_v25, %v1123_v15 }
  0xde   : > { %v747_v30 = vrot.slane %v990_v28, %v1123_v15  ;;  %v756_v31 = vcombine.low %v988_v25, %v990_v28 }
  0xe0   : > { %v750_v32 = vcombine.low %v743_v29, %v747_v30  ;;  %v763_v33 = vrot.slane %v756_v31, %v762_v27 }
  0xe2   : > { %v752_v12 = vmul.f32 %v750_v32, %v1135_v26  ;;  %v770_v13 = vrot.slane %v763_v33, %v762_v27 }
  0xe4   : > { %753 = vst [vmem:[%s421_s16] sm:$0xff] %v752_v12  ;;  %776 = vst.msk [vmem:[%s430_s19] sm:$0x3] %vm774_vm0, %v770_v13 }
  0xe5 PF: > { %s22_s13 = sadd.s32 1, %s1013_s13   ;;  %s1185_s11 = smov %s1009_s12 }
  0xe6   : > { %p19_p5 = scmp.ge.s32.totalorder %s22_s13, 4   ;;  %s1186_s12 = smov %s1188_s7 }
  0xe8   :  { %21 = sbr.rel (!%p19_p5) target bundleno = 3 (0x3), region = 97 }

</bundles_post_ra>
